<compile_context>
chip_gen: v6e
topology: v6e:2x2x1
jax: 0.10.0
libtpu: 0.0.40
codegen_flags: <defaults>
</compile_context>

<pallas_src>
import jax
import jax.numpy as jnp
from jax import lax
from jax.experimental import pallas as pl
from jax.experimental.pallas import tpu as pltpu

_LANE = 128     # lane width: hidden / vocab padded to multiples of this
_TB = 128       # batch rows (contexts) per grid step; fills MXU rows
_NEG = -1e30    # bias value for padded vocab columns (drops out of log_softmax)


def _round_up(x, m):
    return ((x + m - 1) // m) * m


def _make_ngram_kernel(context, emb_dim):
    """Kernel factory; `context` (= n_gram - 1) and `emb_dim` are static Python ints."""

    def kernel(idx_ref, emb_ref, w1_ref, b1_ref, w2_ref, b2_ref, out_ref):
        # idx_ref : VMEM int32 (TB, context)      token indices for this batch tile
        # emb_ref : VMEM bf16  (v_pad, emb_dim)   embedding table (rows zero-padded)
        # w1_ref  : VMEM bf16  (k_pad, h_pad)     linear1 weight, pre-transposed (K, hidden)
        # b1_ref  : VMEM f32   (1, h_pad)
        # w2_ref  : VMEM bf16  (h_pad, v_pad)     linear2 weight, pre-transposed (hidden, vocab)
        # b2_ref  : VMEM f32   (1, v_pad)         padded vocab entries = -1e30
        # out_ref : VMEM f32   (TB, v_pad)        log-probs block (lane-dense)
        tb = out_ref.shape[0]
        v_pad = emb_ref.shape[0]

        tok = idx_ref[...]                                        # (tb, context) int32
        iota_v = lax.broadcasted_iota(jnp.int32, (tb, v_pad), 1)  # (tb, v_pad)
        emb = emb_ref[...]                                        # (tb-independent) bf16

        # Vectorized gather + linear1: for each context position, build a one-hot
        # (tb, v_pad) bf16 matrix (exact 0/1 selection; OOB tokens -> all-zero row),
        # gather rows via an MXU dot, then contract against the matching W1 row-slice.
        h = None
        for i in range(context):                                  # static unroll, tiny
            oh = (tok[:, i:i + 1] == iota_v).astype(jnp.bfloat16)            # (tb, v_pad)
            e_i = jnp.dot(oh, emb, preferred_element_type=jnp.float32)       # (tb, emb_dim)
            e_i = e_i.astype(jnp.bfloat16)                                   # exact (bf16 table)
            w1_i = w1_ref[pl.ds(i * emb_dim, emb_dim), :]                    # (emb_dim, h_pad)
            d = jnp.dot(e_i, w1_i, preferred_element_type=jnp.float32)       # (tb, h_pad)
            h = d if h is None else h + d

        # linear1 bias + ReLU (f32), then bf16 for the second MXU dot
        h = jnp.maximum(h + b1_ref[...], 0.0).astype(jnp.bfloat16)

        # linear2: plain jnp.dot against the pre-transposed (h_pad, v_pad) weight
        logits = jnp.dot(h, w2_ref[...], preferred_element_type=jnp.float32)
        logits = logits + b2_ref[...]                 # padded cols get -1e30 -> vanish below

        # log_softmax over the (padded) vocab axis, all in f32
        m = jnp.max(logits, axis=-1, keepdims=True)
        z = logits - m
        lse = jnp.log(jnp.sum(jnp.exp(z), axis=-1, keepdims=True))
        out_ref[...] = z - lse

    return kernel


def prepare_params(emb_table, w1, b1, w2, b2, *, param_dtype=jnp.bfloat16):
    """One-time parameter prep: pad to lane/sublane-friendly shapes, pre-transpose the
    linear weights to (K, N) layout, and cast table/weights to bf16.  Done once, never
    on the per-forward hot path."""
    emb_table = jnp.asarray(emb_table, jnp.float32)
    w1 = jnp.asarray(w1, jnp.float32)
    b1 = jnp.asarray(b1, jnp.float32)
    w2 = jnp.asarray(w2, jnp.float32)
    b2 = jnp.asarray(b2, jnp.float32)

    vocab, emb_dim = emb_table.shape
    hidden, in_dim = w1.shape
    assert w2.shape == (vocab, hidden)
    context = in_dim // emb_dim
    assert context * emb_dim == in_dim

    k_pad = _round_up(in_dim, 8)        # sublane alignment only (x never materialized)
    h_pad = _round_up(hidden, _LANE)
    v_pad = _round_up(vocab, _LANE)

    emb_p = jnp.zeros((v_pad, emb_dim), param_dtype).at[:vocab, :].set(
        emb_table.astype(param_dtype))
    # Pre-transposed weights: kernel contracts LHS dim 1 vs RHS dim 0 (plain jnp.dot).
    w1_p = jnp.zeros((k_pad, h_pad), param_dtype).at[:in_dim, :hidden].set(
        w1.T.astype(param_dtype))
    w2_p = jnp.zeros((h_pad, v_pad), param_dtype).at[:hidden, :vocab].set(
        w2.T.astype(param_dtype))
    b1_p = jnp.zeros((1, h_pad), jnp.float32).at[0, :hidden].set(b1)
    b2_p = jnp.full((1, v_pad), _NEG, jnp.float32).at[0, :vocab].set(b2)

    return dict(emb=emb_p, w1=w1_p, b1=b1_p, w2=w2_p, b2=b2_p,
                vocab=vocab, emb_dim=emb_dim, hidden=hidden, context=context,
                k_pad=k_pad, h_pad=h_pad, v_pad=v_pad)


def _vmem_limit_bytes(tb, context, v_pad, emb_dim, k_pad, h_pad):
    """Explicit scoped-VMEM budget: real residents (inputs double-buffered even with
    constant index maps) + output block, with ~50% headroom + compiler scratch."""
    ins = (tb * context * 4          # idx block (int32)
           + v_pad * emb_dim * 2     # emb bf16
           + k_pad * h_pad * 2       # W1 bf16
           + h_pad * 4               # b1 f32
           + h_pad * v_pad * 2       # W2 bf16
           + v_pad * 4)              # b2 f32
    outs = tb * v_pad * 4            # out block f32
    resident = 2 * (ins + outs)      # BlockSpec double-buffers every operand
    return int(min(112 << 20, int(resident * 1.5) + (8 << 20)))


def ngram_apply(params, idx_batch):
    """Batched forward: idx_batch (B, context) int32 -> (B, vocab) f32 log-probs."""
    idx_batch = jnp.asarray(idx_batch, jnp.int32)
    B, context = idx_batch.shape
    assert context == params["context"]

    tb = _TB
    b_pad = _round_up(max(B, 1), tb)
    if b_pad != B:
        idx_batch = jnp.concatenate(
            [idx_batch, jnp.zeros((b_pad - B, context), jnp.int32)], axis=0)
    nb = b_pad // tb

    emb_dim = params["emb_dim"]
    k_pad, h_pad, v_pad = params["k_pad"], params["h_pad"], params["v_pad"]

    out = pl.pallas_call(
        _make_ngram_kernel(context, emb_dim),
        out_shape=jax.ShapeDtypeStruct((b_pad, v_pad), jnp.float32),
        grid_spec=pltpu.PrefetchScalarGridSpec(
            num_scalar_prefetch=0,
            grid=(nb,),
            in_specs=[
                pl.BlockSpec((tb, context), lambda b: (b, 0)),       # token ids (per tile)
                # whole arrays resident in VMEM; constant block index => fetched once
                pl.BlockSpec((v_pad, emb_dim), lambda b: (0, 0)),    # emb (bf16)
                pl.BlockSpec((k_pad, h_pad), lambda b: (0, 0)),      # W1^T (bf16)
                pl.BlockSpec((1, h_pad), lambda b: (0, 0)),          # b1 (f32)
                pl.BlockSpec((h_pad, v_pad), lambda b: (0, 0)),      # W2^T (bf16)
                pl.BlockSpec((1, v_pad), lambda b: (0, 0)),          # b2 (f32)
            ],
            out_specs=pl.BlockSpec((tb, v_pad), lambda b: (b, 0)),   # lane-dense output
        ),
        compiler_params=pltpu.CompilerParams(
            dimension_semantics=("parallel",),
            vmem_limit_bytes=_vmem_limit_bytes(tb, context, v_pad, emb_dim, k_pad, h_pad)),
    )(idx_batch, params["emb"], params["w1"], params["b1"], params["w2"], params["b2"])

    return out[:B, :params["vocab"]]


def make_ngram_forward(emb_table, w1, b1, w2, b2):
    """Module-equivalent forward factory: parameters are prepared ONCE (hoisted out of
    the per-call path).  Returned callable: inputs (context,) -> ((1, vocab) log-probs,
    embedding weight table)."""
    params = prepare_params(emb_table, w1, b1, w2, b2)
    emb_table = jnp.asarray(emb_table)

    def forward(inputs):
        log_probs = ngram_apply(params, jnp.asarray(inputs, jnp.int32)[None, :])
        # PyTorch returns the nn.Embedding module; here we return its weight table.
        return log_probs, emb_table

    return forward


def ngram_forward(inputs, emb_table, w1, b1, w2, b2):
    """One-shot convenience wrapper.  For repeated calls use make_ngram_forward /
    prepare_params so weight pad/cast/transposition does not land on the hot path."""
    return make_ngram_forward(emb_table, w1, b1, w2, b2)(inputs)


def _reference_forward(idx_batch, emb_table, w1, b1, w2, b2):
    # Pure-JAX reference matching the kernel's bf16-weight / f32-accumulate numerics.
    q = lambda a: a.astype(jnp.bfloat16).astype(jnp.float32)
    x = q(emb_table)[idx_batch].reshape(idx_batch.shape[0], -1)
    h = q(jax.nn.relu(x @ q(w1).T + b1))
    out = h @ q(w2).T + b2
    return jax.nn.log_softmax(out, axis=-1)


if __name__ == "__main__":
    # Small shapes consistent with NGram(vocab_size, embedding_dim, hidden_size, n_gram)
    vocab_size, embedding_dim, hidden_size, n_gram = 64, 16, 32, 4
    context = n_gram - 1
    in_dim = context * embedding_dim

    key = jax.random.PRNGKey(0)
    k_emb, k_w1, k_b1, k_w2, k_b2, k_idx = jax.random.split(key, 6)

    emb_table = jax.random.normal(k_emb, (vocab_size, embedding_dim), jnp.float32)
    w1 = jax.random.normal(k_w1, (hidden_size, in_dim), jnp.float32) * 0.1
    b1 = jax.random.normal(k_b1, (hidden_size,), jnp.float32) * 0.1
    w2 = jax.random.normal(k_w2, (vocab_size, hidden_size), jnp.float32) * 0.1
    b2 = jax.random.normal(k_b2, (vocab_size,), jnp.float32) * 0.1

    # --- module-equivalent single-context forward (params prepared once) -----------
    forward = make_ngram_forward(emb_table, w1, b1, w2, b2)
    inputs = jax.random.randint(k_idx, (context,), 0, vocab_size, jnp.int32)
    log_probs, emb_out = forward(inputs)
    log_probs = jax.block_until_ready(log_probs)
    ref = _reference_forward(inputs[None, :], emb_table, w1, b1, w2, b2)
    assert log_probs.shape == (1, vocab_size)
    assert jnp.max(jnp.abs(log_probs - ref)) < 5e-3  # bf16-quantized tolerance

    # --- batched path: B=200 -> padded to 256 -> 2 grid steps of TB=128 -------------
    params = prepare_params(emb_table, w1, b1, w2, b2)
    idx_batch = jax.random.randint(k_idx, (200, context), 0, vocab_size, jnp.int32)
    log_probs_b = jax.block_until_ready(ngram_apply(params, idx_batch))
    ref_b = _reference_forward(idx_batch, emb_table, w1, b1, w2, b2)
    assert log_probs_b.shape == (200, vocab_size)
    assert jnp.max(jnp.abs(log_probs_b - ref_b)) < 5e-3

    print("KERNEL_OK")
</pallas_src>

<mosaic_0001>
module attributes {stable_mosaic.version = 11 : i64} {
  func.func @kernel(%arg0: i32, %arg1: memref<128x3xi32, #tpu.memory_space<vmem>>, %arg2: memref<128x16xbf16, #tpu.memory_space<vmem>>, %arg3: memref<48x128xbf16, #tpu.memory_space<vmem>>, %arg4: memref<1x128xf32, #tpu.memory_space<vmem>>, %arg5: memref<128x128xbf16, #tpu.memory_space<vmem>>, %arg6: memref<1x128xf32, #tpu.memory_space<vmem>>, %arg7: memref<128x128xf32, #tpu.memory_space<vmem>>) attributes {dimension_semantics = [#tpu.dimension_semantics<parallel>], iteration_bounds = array<i64: 1>, scalar_prefetch = 0 : i64, scratch_operands = 0 : i64, tpu.core_type = #tpu.core_type<tc>, window_params = [{transform_indices = @transform_0, window_bounds = array<i64: 128, 3>}, {pipeline_mode = #tpu.pipeline_mode<synchronous>, transform_indices = @transform_1, window_bounds = array<i64: 128, 16>}, {pipeline_mode = #tpu.pipeline_mode<synchronous>, transform_indices = @transform_2, window_bounds = array<i64: 48, 128>}, {pipeline_mode = #tpu.pipeline_mode<synchronous>, transform_indices = @transform_3, window_bounds = array<i64: 1, 128>}, {pipeline_mode = #tpu.pipeline_mode<synchronous>, transform_indices = @transform_4, window_bounds = array<i64: 128, 128>}, {pipeline_mode = #tpu.pipeline_mode<synchronous>, transform_indices = @transform_5, window_bounds = array<i64: 1, 128>}, {transform_indices = @transform_6, window_bounds = array<i64: 128, 128>}]} {
    %c0 = arith.constant 0 : index
    %c0_0 = arith.constant 0 : index
    %0 = vector.load %arg1[%c0, %c0_0] : memref<128x3xi32, #tpu.memory_space<vmem>>, vector<128x3xi32>
    %1 = tpu.iota {dimensions = array<i32: 1>} : vector<128x128xi32>
    %c0_1 = arith.constant 0 : index
    %c0_2 = arith.constant 0 : index
    %2 = vector.load %arg2[%c0_1, %c0_2] : memref<128x16xbf16, #tpu.memory_space<vmem>>, vector<128x16xbf16>
    %3 = vector.extract_strided_slice %0 {offsets = [0, 0], sizes = [128, 1], strides = [1, 1]} : vector<128x3xi32> to vector<128x1xi32>
    %4 = vector.broadcast %3 : vector<128x1xi32> to vector<128x128xi32>
    %5 = arith.cmpi eq, %4, %1 : vector<128x128xi32>
    %6 = arith.extui %5 : vector<128x128xi1> to vector<128x128xi32>
    %7 = arith.sitofp %6 : vector<128x128xi32> to vector<128x128xf32>
    %8 = arith.truncf %7 : vector<128x128xf32> to vector<128x128xbf16>
    %cst = arith.constant dense<0.000000e+00> : vector<128x16xf32>
    %9 = tpu.matmul %8, %2, %cst {dimension_numbers = #tpu.dot_dimension_numbers<[1], [0], [0], [1], [0, 0, 1, 1], [], []>} : vector<128x128xbf16>, vector<128x16xbf16>, vector<128x16xf32> -> vector<128x16xf32>
    %10 = arith.truncf %9 : vector<128x16xf32> to vector<128x16xbf16>
    %c0_3 = arith.constant 0 : index
    %c0_4 = arith.constant 0 : index
    %11 = vector.load %arg3[%c0_3, %c0_4] : memref<48x128xbf16, #tpu.memory_space<vmem>>, vector<16x128xbf16>
    %cst_5 = arith.constant dense<0.000000e+00> : vector<128x128xf32>
    %12 = tpu.matmul %10, %11, %cst_5 {dimension_numbers = #tpu.dot_dimension_numbers<[1], [0], [0], [1], [0, 0, 1, 1], [], []>} : vector<128x16xbf16>, vector<16x128xbf16>, vector<128x128xf32> -> vector<128x128xf32>
    %13 = vector.extract_strided_slice %0 {offsets = [0, 1], sizes = [128, 1], strides = [1, 1]} : vector<128x3xi32> to vector<128x1xi32>
    %14 = vector.broadcast %13 : vector<128x1xi32> to vector<128x128xi32>
    %15 = arith.cmpi eq, %14, %1 : vector<128x128xi32>
    %16 = arith.extui %15 : vector<128x128xi1> to vector<128x128xi32>
    %17 = arith.sitofp %16 : vector<128x128xi32> to vector<128x128xf32>
    %18 = arith.truncf %17 : vector<128x128xf32> to vector<128x128xbf16>
    %cst_6 = arith.constant dense<0.000000e+00> : vector<128x16xf32>
    %19 = tpu.matmul %18, %2, %cst_6 {dimension_numbers = #tpu.dot_dimension_numbers<[1], [0], [0], [1], [0, 0, 1, 1], [], []>} : vector<128x128xbf16>, vector<128x16xbf16>, vector<128x16xf32> -> vector<128x16xf32>
    %20 = arith.truncf %19 : vector<128x16xf32> to vector<128x16xbf16>
    %c16 = arith.constant 16 : index
    %c0_7 = arith.constant 0 : index
    %21 = vector.load %arg3[%c16, %c0_7] : memref<48x128xbf16, #tpu.memory_space<vmem>>, vector<16x128xbf16>
    %cst_8 = arith.constant dense<0.000000e+00> : vector<128x128xf32>
    %22 = tpu.matmul %20, %21, %cst_8 {dimension_numbers = #tpu.dot_dimension_numbers<[1], [0], [0], [1], [0, 0, 1, 1], [], []>} : vector<128x16xbf16>, vector<16x128xbf16>, vector<128x128xf32> -> vector<128x128xf32>
    %23 = arith.addf %12, %22 : vector<128x128xf32>
    %24 = vector.extract_strided_slice %0 {offsets = [0, 2], sizes = [128, 1], strides = [1, 1]} : vector<128x3xi32> to vector<128x1xi32>
    %25 = vector.broadcast %24 : vector<128x1xi32> to vector<128x128xi32>
    %26 = arith.cmpi eq, %25, %1 : vector<128x128xi32>
    %27 = arith.extui %26 : vector<128x128xi1> to vector<128x128xi32>
    %28 = arith.sitofp %27 : vector<128x128xi32> to vector<128x128xf32>
    %29 = arith.truncf %28 : vector<128x128xf32> to vector<128x128xbf16>
    %cst_9 = arith.constant dense<0.000000e+00> : vector<128x16xf32>
    %30 = tpu.matmul %29, %2, %cst_9 {dimension_numbers = #tpu.dot_dimension_numbers<[1], [0], [0], [1], [0, 0, 1, 1], [], []>} : vector<128x128xbf16>, vector<128x16xbf16>, vector<128x16xf32> -> vector<128x16xf32>
    %31 = arith.truncf %30 : vector<128x16xf32> to vector<128x16xbf16>
    %c32 = arith.constant 32 : index
    %c0_10 = arith.constant 0 : index
    %32 = vector.load %arg3[%c32, %c0_10] : memref<48x128xbf16, #tpu.memory_space<vmem>>, vector<16x128xbf16>
    %cst_11 = arith.constant dense<0.000000e+00> : vector<128x128xf32>
    %33 = tpu.matmul %31, %32, %cst_11 {dimension_numbers = #tpu.dot_dimension_numbers<[1], [0], [0], [1], [0, 0, 1, 1], [], []>} : vector<128x16xbf16>, vector<16x128xbf16>, vector<128x128xf32> -> vector<128x128xf32>
    %34 = arith.addf %23, %33 : vector<128x128xf32>
    %c0_12 = arith.constant 0 : index
    %c0_13 = arith.constant 0 : index
    %35 = vector.load %arg4[%c0_12, %c0_13] : memref<1x128xf32, #tpu.memory_space<vmem>>, vector<1x128xf32>
    %36 = vector.broadcast %35 : vector<1x128xf32> to vector<128x128xf32>
    %37 = arith.addf %34, %36 : vector<128x128xf32>
    %cst_14 = arith.constant 0.000000e+00 : f32
    %38 = vector.broadcast %cst_14 : f32 to vector<128x128xf32>
    %39 = arith.maximumf %37, %38 : vector<128x128xf32>
    %40 = arith.truncf %39 : vector<128x128xf32> to vector<128x128xbf16>
    %c0_15 = arith.constant 0 : index
    %c0_16 = arith.constant 0 : index
    %41 = vector.load %arg5[%c0_15, %c0_16] : memref<128x128xbf16, #tpu.memory_space<vmem>>, vector<128x128xbf16>
    %cst_17 = arith.constant dense<0.000000e+00> : vector<128x128xf32>
    %42 = tpu.matmul %40, %41, %cst_17 {dimension_numbers = #tpu.dot_dimension_numbers<[1], [0], [0], [1], [0, 0, 1, 1], [], []>} : vector<128x128xbf16>, vector<128x128xbf16>, vector<128x128xf32> -> vector<128x128xf32>
    %c0_18 = arith.constant 0 : index
    %c0_19 = arith.constant 0 : index
    %43 = vector.load %arg6[%c0_18, %c0_19] : memref<1x128xf32, #tpu.memory_space<vmem>>, vector<1x128xf32>
    %44 = vector.broadcast %43 : vector<1x128xf32> to vector<128x128xf32>
    %45 = arith.addf %42, %44 : vector<128x128xf32>
    %cst_20 = arith.constant dense<0xFF800000> : vector<128xf32>
    %46 = vector.multi_reduction <maximumf>, %45, %cst_20 [1] : vector<128x128xf32> to vector<128xf32>
    %47 = vector.shape_cast %46 : vector<128xf32> to vector<128x1xf32>
    %48 = vector.broadcast %47 : vector<128x1xf32> to vector<128x128xf32>
    %49 = arith.subf %45, %48 : vector<128x128xf32>
    %50 = math.exp %49 : vector<128x128xf32>
    %cst_21 = arith.constant dense<0.000000e+00> : vector<128xf32>
    %51 = vector.multi_reduction <add>, %50, %cst_21 [1] : vector<128x128xf32> to vector<128xf32>
    %52 = vector.shape_cast %51 : vector<128xf32> to vector<128x1xf32>
    %53 = math.log %52 : vector<128x1xf32>
    %54 = vector.broadcast %53 : vector<128x1xf32> to vector<128x128xf32>
    %55 = arith.subf %49, %54 : vector<128x128xf32>
    %c0_22 = arith.constant 0 : index
    %c0_23 = arith.constant 0 : index
    %56 = vector.load %arg7[%c0_22, %c0_23] : memref<128x128xf32, #tpu.memory_space<vmem>>, vector<128x128xf32>
    tpu.vector_store %arg7[%c0_22, %c0_23], %55 {strides = array<i32>} : memref<128x128xf32, #tpu.memory_space<vmem>>, vector<128x128xf32>,
    return
  }
  func.func @transform_0(%arg0: i32) -> (i32, i32) {
    %c0_i32 = arith.constant 0 : i32
    %c0_i32_0 = arith.constant 0 : i32
    return %arg0, %c0_i32 : i32, i32
  }
  func.func @transform_1(%arg0: i32) -> (i32, i32) {
    %c0_i32 = arith.constant 0 : i32
    %c0_i32_0 = arith.constant 0 : i32
    %c0_i32_1 = arith.constant 0 : i32
    return %c0_i32, %c0_i32_0 : i32, i32
  }
  func.func @transform_2(%arg0: i32) -> (i32, i32) {
    %c0_i32 = arith.constant 0 : i32
    %c0_i32_0 = arith.constant 0 : i32
    %c0_i32_1 = arith.constant 0 : i32
    return %c0_i32, %c0_i32_0 : i32, i32
  }
  func.func @transform_3(%arg0: i32) -> (i32, i32) {
    %c0_i32 = arith.constant 0 : i32
    %c0_i32_0 = arith.constant 0 : i32
    %c0_i32_1 = arith.constant 0 : i32
    return %c0_i32, %c0_i32_0 : i32, i32
  }
  func.func @transform_4(%arg0: i32) -> (i32, i32) {
    %c0_i32 = arith.constant 0 : i32
    %c0_i32_0 = arith.constant 0 : i32
    %c0_i32_1 = arith.constant 0 : i32
    return %c0_i32, %c0_i32_0 : i32, i32
  }
  func.func @transform_5(%arg0: i32) -> (i32, i32) {
    %c0_i32 = arith.constant 0 : i32
    %c0_i32_0 = arith.constant 0 : i32
    %c0_i32_1 = arith.constant 0 : i32
    return %c0_i32, %c0_i32_0 : i32, i32
  }
  func.func @transform_6(%arg0: i32) -> (i32, i32) {
    %c0_i32 = arith.constant 0 : i32
    %c0_i32_0 = arith.constant 0 : i32
    return %arg0, %c0_i32 : i32, i32
  }
}

</mosaic_0001>

<bundles_post_ra>
// kernel: tpu_custom_call.1
= control target key start
LH: loop header
LB: loop body
LE: loop exit
PB: predicated region body
PF: predicated region fallthrough
CT: control target
= control target key end

     0   :  { %v2093_v2 = vmov 1   ;;  %s2634_s0 = inlined_call_operand.vmem [shape: s32[128,3], index: 0, kind: input, shape index: {}]   ;;  %s2635_s1 = inlined_call_operand.vmem [shape: bf16[128,16], index: 1, kind: input, shape index: {}]   ;;  %s2636_s2 = inlined_call_operand.vmem [shape: bf16[48,128], index: 2, kind: input, shape index: {}]   ;;  %s2637_s3 = inlined_call_operand.vmem [shape: f32[1,128], index: 3, kind: input, shape index: {}]   ;;  %s2638_s4 = inlined_call_operand.vmem [shape: bf16[128,128], index: 4, kind: input, shape index: {}]   ;;  %s2639_s5 = inlined_call_operand.vmem [shape: f32[1,128], index: 5, kind: input, shape index: {}]   ;;  %s2640_s6 = inlined_call_operand.hbm [shape: f32[128,128], index: 6, kind: output, shape index: {}]  }
   0x1   :  { %v2138_v0 = vld [vmem:[%s2634_s0 + $0x10] sm:$0xff]  ;;  %v2143_v1 = vld [vmem:[%s2634_s0] sm:$0xff]  ;;  %1983 = vset.pattern.permute.xlu1 %v2093_v2  ;;  %1982 = vset.pattern.permute.xlu0 %v2093_v2  ;;  %v2150_v3 = vld [vmem:[%s2634_s0 + $0x18] sm:$0xff] }
   0x2   :  { %325 = vperm.xlu1 %1983, %v2138_v0   ;;  %319 = vperm.xlu0 %1982, %v2143_v1   ;;  %v2155_v4 = vld [vmem:[%s2634_s0 + $0x8] sm:$0xff]  ;;  %v2165_v6 = vld [vmem:[%s2634_s0 + $0x20] sm:$0xff]  ;;  %v2172_v7 = vld [vmem:[%s2635_s1 + $0x38] sm:$0xff]  }
   0x3   :  { %v2160_v5 = vld [vmem:[%s2634_s0 + $0x28] sm:$0xff]  ;;  %v2177_v8 = vld [vmem:[%s2635_s1 + $0x30] sm:$0xff]   ;;  %1809 = vmatprep.subr.bf16.mxu1 %v2172_v7  ;;  %1777 = vmatprep.subr.bf16.mxu0 %v2172_v7  ;;  %v2184_v9 = vld [vmem:[%s2634_s0 + $0x38] sm:$0xff] }
   0x4   :  { %1810 = vmatpush3.bf16.msra.mxu1 %v2172_v7  ;;  %1778 = vmatpush3.bf16.msra.mxu0 %v2172_v7  ;;  %v2193_v10 = vld [vmem:[%s2634_s0 + $0x30] sm:$0xff]  ;;  %v2199_v11 = vld [vmem:[%s2635_s1 + $0x28] sm:$0xff]   ;;  %v2210_v13 = vld [vmem:[%s2634_s0 + $0x40] sm:$0xff] }
   0x5   :  { %1811 = vmatprep.subr.bf16.mxu1 %v2177_v8  ;;  %1779 = vmatprep.subr.bf16.mxu0 %v2177_v8  ;;  %v2205_v12 = vld [vmem:[%s2634_s0 + $0x48] sm:$0xff]  ;;  %v2216_v14 = vld [vmem:[%s2635_s1 + $0x20] sm:$0xff]   ;;  %v2226_v15 = vld [vmem:[%s2634_s0 + $0x58] sm:$0xff] }
   0x6   :  { %328 = vperm.xlu1 %1983, %v2150_v3   ;;  %322 = vperm.xlu0 %1982, %v2155_v4   ;;  %v2231_v16 = vld [vmem:[%s2634_s0 + $0x50] sm:$0xff]  ;;  %v2237_v17 = vld [vmem:[%s2635_s1 + $0x18] sm:$0xff]  }
   0x8   :  { %1812 = vmatpush3.bf16.msra.mxu1 %v2177_v8  ;;  %1780 = vmatpush3.bf16.msra.mxu0 %v2177_v8 }
   0x9   :  { %1813 = vmatprep.subr.bf16.mxu1 %v2199_v11  ;;  %1781 = vmatprep.subr.bf16.mxu0 %v2199_v11 }
   0xa   :  { %334 = vperm.xlu1 %1983, %v2160_v5   ;;  %331 = vperm.xlu0 %1982, %v2165_v6  }
   0xc   :  { %1814 = vmatpush3.bf16.msra.mxu1 %v2199_v11  ;;  %1782 = vmatpush3.bf16.msra.mxu0 %v2199_v11 }
   0xd   :  { %1815 = vmatprep.subr.bf16.mxu1 %v2216_v14  ;;  %1783 = vmatprep.subr.bf16.mxu0 %v2216_v14 }
   0xe   :  { %340 = vperm.xlu1 %1983, %v2184_v9   ;;  %337 = vperm.xlu0 %1982, %v2193_v10  }
  0x12   :  { %346 = vperm.xlu1 %1983, %v2205_v12   ;;  %343 = vperm.xlu0 %1982, %v2210_v13  }
  0x13   :  { %11 = vsyncpa [#allocation3], 0  ;;  %1816 = vmatpush3.bf16.msra.mxu1 %v2216_v14  ;;  %1784 = vmatpush3.bf16.msra.mxu0 %v2216_v14  ;;  %v2251_v18 = vld [vmem:[%s2634_s0 + $0x68] sm:$0xff]  ;;  %v37_v19 = vld [vmem:[%s2634_s0 + $0x60] sm:$0xff]  ;;  %v2094_v25 = vmov 0   ;;  %v2095_v27 = vmov 2   ;;  %v41_v28 = vlaneseq }
  0x14   :  { %1817 = vmatprep.subr.bf16.mxu1 %v2237_v17  ;;  %v2260_v20 = vld [vmem:[%s2635_s1 + $0x10] sm:$0xff]   ;;  %1785 = vmatprep.subr.bf16.mxu0 %v2237_v17  ;;  %v40_v21 = vld [vmem:[%s2634_s0 + $0x78] sm:$0xff]  ;;  %v2276_v23 = vld [vmem:[%s2635_s1 + $0x8] sm:$0xff]   ;;  %v2096_v34 = vmov 1.0|1.0  }
  0x15   :  { %v39_v22 = vld [vmem:[%s2634_s0 + $0x70] sm:$0xff]  ;;  %v2286_v24 = vld [vmem:[%s2635_s1] sm:$0xff]   ;;  %v2310_v26 = vld [vmem:[%s2636_s2 + $0x8] sm:$0xff]   ;;  %v2326_v31 = vand.u32 127, %v41_v28 }
  0x16   :  { %352 = vperm.xlu1 %1983, %v2226_v15   ;;  %349 = vperm.xlu0 %1982, %v2231_v16   ;;  %v1997_v63 = vld [vmem:[%s2636_s2] sm:$0xff]  }
  0x17   :  { %1818 = vmatpush3.bf16.msra.mxu1 %v2237_v17  ;;  %1786 = vmatpush3.bf16.msra.mxu0 %v2237_v17 }
  0x18   :  { %1819 = vmatprep.subr.bf16.mxu1 %v2260_v20  ;;  %1787 = vmatprep.subr.bf16.mxu0 %v2260_v20 }
  0x1a   :  { %358 = vperm.xlu1 %1983, %v2251_v18   ;;  %355 = vperm.xlu0 %1982, %v37_v19  }
  0x1b   :  { %1820 = vmatpush3.bf16.msra.mxu1 %v2260_v20  ;;  %1788 = vmatpush3.bf16.msra.mxu0 %v2260_v20 }
  0x1c   :  { %1821 = vmatprep.subr.bf16.mxu1 %v2276_v23  ;;  %1789 = vmatprep.subr.bf16.mxu0 %v2276_v23 }
  0x1e   :  { %364 = vperm.xlu1 %1983, %v40_v21   ;;  %361 = vperm.xlu0 %1982, %v39_v22  }
  0x1f   :  { %1822 = vmatpush3.bf16.msra.mxu1 %v2276_v23  ;;  %1790 = vmatpush3.bf16.msra.mxu0 %v2276_v23 }
  0x20   :  { %1823 = vmatprep.subr.bf16.mxu1 %v2286_v24  ;;  %1791 = vmatprep.subr.bf16.mxu0 %v2286_v24 }
  0x22   :  { %1985 = vset.pattern.permute.xlu1 %v2094_v25  ;;  %1984 = vset.pattern.permute.xlu0 %v2094_v25 }
  0x23   :  { %63 = vperm.xlu1 %1985, %v2155_v4   ;;  %60 = vperm.xlu0 %1984, %v2143_v1  }
  0x24   :  { %1824 = vmatpush3.bf16.msra.mxu1 %v2286_v24  ;;  %1792 = vmatpush3.bf16.msra.mxu0 %v2286_v24 }
  0x25   :  { %1841 = vmatprep.subr.bf16.mxu0 %v2310_v26  ;;  %1859 = vmatprep.subr.bf16.mxu1 %v1997_v63 }
  0x27   :  { %66 = vperm.xlu1 %1985, %v2138_v0   ;;  %69 = vperm.xlu0 %1984, %v2150_v3  }
  0x2b   :  { %72 = vperm.xlu1 %1985, %v2165_v6   ;;  %75 = vperm.xlu0 %1984, %v2160_v5  }
  0x2f   :  { %78 = vperm.xlu1 %1985, %v2193_v10   ;;  %81 = vperm.xlu0 %1984, %v2184_v9  }
  0x33   :  { %84 = vperm.xlu1 %1985, %v2210_v13   ;;  %87 = vperm.xlu0 %1984, %v2205_v12  }
  0x37   :  { %90 = vperm.xlu1 %1985, %v2231_v16   ;;  %93 = vperm.xlu0 %1984, %v2226_v15  }
  0x3b   :  { %96 = vperm.xlu1 %1985, %v37_v19   ;;  %99 = vperm.xlu0 %1984, %v2251_v18  }
  0x3f   :  { %102 = vperm.xlu1 %1985, %v39_v22   ;;  %105 = vperm.xlu0 %1984, %v40_v21  }
  0x43   :  { %1986 = vset.pattern.permute.xlu1 %v2095_v27  ;;  %1987 = vset.pattern.permute.xlu0 %v2095_v27 }
  0x44   :  { %785 = vperm.xlu1 %1986, %v2143_v1   ;;  %788 = vperm.xlu0 %1987, %v2155_v4  }
  0x48   :  { %791 = vperm.xlu1 %1986, %v2138_v0   ;;  %797 = vperm.xlu0 %1987, %v2165_v6  }
  0x4c   :  { %794 = vperm.xlu1 %1986, %v2150_v3   ;;  %803 = vperm.xlu0 %1987, %v2193_v10  }
  0x50   :  { %800 = vperm.xlu1 %1986, %v2160_v5   ;;  %809 = vperm.xlu0 %1987, %v2210_v13  }
  0x54   :  { %806 = vperm.xlu1 %1986, %v2184_v9   ;;  %815 = vperm.xlu0 %1987, %v2231_v16  }
  0x58   :  { %812 = vperm.xlu1 %1986, %v2205_v12   ;;  %821 = vperm.xlu0 %1987, %v37_v19  }
  0x5c   :  { %818 = vperm.xlu1 %1986, %v2226_v15   ;;  %827 = vperm.xlu0 %1987, %v39_v22  }
  0x60   :  { %824 = vperm.xlu1 %1986, %v2251_v18  }
  0x64   :  { %830 = vperm.xlu1 %1986, %v40_v21  }
  0x7d   :  { %v326_v29 = vpop.permute.xlu1 %325  ;;  %v320_v30 = vpop.permute.xlu0 %319 }
  0x7e   :  { %vm368_vm0 = vcmp.eq.s32.totalorder %v326_v29, %v2326_v31  ;;  %vm366_vm3 = vcmp.eq.s32.totalorder %v320_v30, %v2326_v31 }
  0x81   :  { %v329_v32 = vpop.permute.xlu1 %328  ;;  %v323_v33 = vpop.permute.xlu0 %322 }
  0x82   :  { %vm369_vm1 = vcmp.eq.s32.totalorder %v329_v32, %v2326_v31  ;;  %vm367_vm2 = vcmp.eq.s32.totalorder %v323_v33, %v2326_v31 }
  0x83   :  { %vm1603_vm4 = vmpackc.low %vm369_vm1, %vm368_vm0 }
  0x84   :  { %vm1601_vm5 = vmpackc.low %vm367_vm2, %vm366_vm3 }
  0x85   :  { %1825 = vmatprep.mubr.msk.bf16.mxu1 %vm1601_vm5, %v2096_v34  ;;  %v335_v35 = vpop.permute.xlu1 %334  ;;  %v332_v36 = vpop.permute.xlu0 %331 }
  0x86   :  { %vm371_vm6 = vcmp.eq.s32.totalorder %v335_v35, %v2326_v31  ;;  %1826 = vmatmul.mubr.msk.bf16.vlgmr.msra.gmra.mxu1 %vm1603_vm4, %v2096_v34  ;;  %vm370_vm7 = vcmp.eq.s32.totalorder %v332_v36, %v2326_v31 }
  0x87   :  { %vm1605_vm8 = vmpackc.low %vm371_vm6, %vm370_vm7  ;;  %1860 = vmatpush3.bf16.msra.mxu1 %v1997_v63 }
  0x88   :  { %1829 = vmatprep.mubr.msk.bf16.mxu1 %vm1605_vm8, %v2096_v34 }
  0x89   :  { %v341_v37 = vpop.permute.xlu1 %340  ;;  %v338_v38 = vpop.permute.xlu0 %337 }
  0x8a   :  { %vm373_vm9 = vcmp.eq.s32.totalorder %v341_v37, %v2326_v31  ;;  %vm372_vm10 = vcmp.eq.s32.totalorder %v338_v38, %v2326_v31 }
  0x8b   :  { %vm1607_vm11 = vmpackc.low %vm373_vm9, %vm372_vm10 }
  0x8d   :  { %v347_v39 = vpop.permute.xlu1 %346  ;;  %v344_v40 = vpop.permute.xlu0 %343 }
  0x8e   :  { %vm375_vm12 = vcmp.eq.s32.totalorder %v347_v39, %v2326_v31  ;;  %1830 = vmatmul.mubr.msk.bf16.gmra.mxu1 %vm1607_vm11, %v2096_v34  ;;  %vm374_vm13 = vcmp.eq.s32.totalorder %v344_v40, %v2326_v31 }
  0x8f   :  { %vm1609_vm14 = vmpackc.low %vm375_vm12, %vm374_vm13 }
  0x90   :  { %1833 = vmatprep.mubr.msk.bf16.mxu1 %vm1609_vm14, %v2096_v34 }
  0x91   :  { %v353_v41 = vpop.permute.xlu1 %352  ;;  %v350_v42 = vpop.permute.xlu0 %349 }
  0x92   :  { %vm377_vm15 = vcmp.eq.s32.totalorder %v353_v41, %v2326_v31  ;;  %vm376_vm0 = vcmp.eq.s32.totalorder %v350_v42, %v2326_v31 }
  0x93   :  { %vm1611_vm1 = vmpackc.low %vm377_vm15, %vm376_vm0 }
  0x95   :  { %v359_v43 = vpop.permute.xlu1 %358  ;;  %v356_v44 = vpop.permute.xlu0 %355 }
  0x96   :  { %vm379_vm2 = vcmp.eq.s32.totalorder %v359_v43, %v2326_v31  ;;  %1834 = vmatmul.mubr.msk.bf16.gmra.mxu1 %vm1611_vm1, %v2096_v34  ;;  %vm378_vm3 = vcmp.eq.s32.totalorder %v356_v44, %v2326_v31 }
  0x97   :  { %vm1613_vm4 = vmpackc.low %vm379_vm2, %vm378_vm3 }
  0x98   :  { %1837 = vmatprep.mubr.msk.bf16.mxu1 %vm1613_vm4, %v2096_v34 }
  0x99   :  { %v365_v45 = vpop.permute.xlu1 %364  ;;  %v362_v46 = vpop.permute.xlu0 %361 }
  0x9a   :  { %vm381_vm5 = vcmp.eq.s32.totalorder %v365_v45, %v2326_v31  ;;  %vm380_vm6 = vcmp.eq.s32.totalorder %v362_v46, %v2326_v31 }
  0x9b   :  { %vm1615_vm7 = vmpackc.low %vm381_vm5, %vm380_vm6 }
  0x9e   :  { %1838 = vmatmul.mubr.msk.bf16.gmra.mxu1 %vm1615_vm7, %v2096_v34  ;;  %v64_v47 = vpop.permute.xlu1 %63  ;;  %v61_v48 = vpop.permute.xlu0 %60 }
  0x9f   :  { %vm108_vm8 = vcmp.eq.s32.totalorder %v64_v47, %v2326_v31  ;;  %vm107_vm9 = vcmp.eq.s32.totalorder %v61_v48, %v2326_v31 }
  0xa0   :  { %vm1569_vm10 = vmpackc.low %vm108_vm8, %vm107_vm9 }
  0xa1   :  { %1793 = vmatprep.mubr.msk.bf16.mxu0 %vm1569_vm10, %v2096_v34 }
  0xa2   :  { %v67_v49 = vpop.permute.xlu1 %66  ;;  %v70_v50 = vpop.permute.xlu0 %69 }
  0xa3   :  { %vm109_vm11 = vcmp.eq.s32.totalorder %v67_v49, %v2326_v31  ;;  %vm110_vm12 = vcmp.eq.s32.totalorder %v70_v50, %v2326_v31 }
  0xa4   :  { %vm1571_vm13 = vmpackc.low %vm110_vm12, %vm109_vm11 }
  0xa5   :  { %1794 = vmatmul.mubr.msk.bf16.vlgmr.msra.gmra.mxu0 %vm1571_vm13, %v2096_v34 }
  0xa6   :  { %v73_v51 = vpop.permute.xlu1 %72  ;;  %v76_v52 = vpop.permute.xlu0 %75  ;;  %1842 = vmatpush3.bf16.msra.mxu0 %v2310_v26 }
  0xa7   :  { %vm111_vm14 = vcmp.eq.s32.totalorder %v73_v51, %v2326_v31  ;;  %vm112_vm15 = vcmp.eq.s32.totalorder %v76_v52, %v2326_v31  ;;  %1877 = vmatprep.subr.bf16.mxu0 %v2172_v7 }
  0xa8   :  { %vm1573_vm0 = vmpackc.low %vm112_vm15, %vm111_vm14 }
  0xa9   :  { %1797 = vmatprep.mubr.msk.bf16.mxu0 %vm1573_vm0, %v2096_v34  ;;  %vm535_vm0 = vcmask 130048  }
  0xaa   :  { %v79_v53 = vpop.permute.xlu1 %78  ;;  %v82_v54 = vpop.permute.xlu0 %81 }
  0xab   :  { %vm113_vm1 = vcmp.eq.s32.totalorder %v79_v53, %v2326_v31  ;;  %vm114_vm2 = vcmp.eq.s32.totalorder %v82_v54, %v2326_v31 }
  0xac   :  { %vm1575_vm3 = vmpackc.low %vm114_vm2, %vm113_vm1 }
  0xad   :  { %1798 = vmatmul.mubr.msk.bf16.gmra.mxu0 %vm1575_vm3, %v2096_v34 }
  0xae   :  { %v85_v55 = vpop.permute.xlu1 %84  ;;  %v88_v56 = vpop.permute.xlu0 %87 }
  0xaf   :  { %vm115_vm4 = vcmp.eq.s32.totalorder %v85_v55, %v2326_v31  ;;  %vm116_vm5 = vcmp.eq.s32.totalorder %v88_v56, %v2326_v31 }
  0xb0   :  { %vm1577_vm6 = vmpackc.low %vm116_vm5, %vm115_vm4 }
  0xb1   :  { %1801 = vmatprep.mubr.msk.bf16.mxu0 %vm1577_vm6, %v2096_v34 }
  0xb2   :  { %v91_v57 = vpop.permute.xlu1 %90  ;;  %v94_v58 = vpop.permute.xlu0 %93 }
  0xb3   :  { %vm117_vm7 = vcmp.eq.s32.totalorder %v91_v57, %v2326_v31  ;;  %vm118_vm8 = vcmp.eq.s32.totalorder %v94_v58, %v2326_v31 }
  0xb4   :  { %vm1579_vm9 = vmpackc.low %vm118_vm8, %vm117_vm7 }
  0xb5   :  { %1802 = vmatmul.mubr.msk.bf16.gmra.mxu0 %vm1579_vm9, %v2096_v34 }
  0xb6   :  { %v97_v59 = vpop.permute.xlu1 %96  ;;  %v100_v60 = vpop.permute.xlu0 %99 }
  0xb7   :  { %vm119_vm10 = vcmp.eq.s32.totalorder %v97_v59, %v2326_v31  ;;  %vm120_vm11 = vcmp.eq.s32.totalorder %v100_v60, %v2326_v31 }
  0xb8   :  { %vm1581_vm12 = vmpackc.low %vm120_vm11, %vm119_vm10 }
  0xb9   :  { %1805 = vmatprep.mubr.msk.bf16.mxu0 %vm1581_vm12, %v2096_v34 }
  0xba   :  { %v103_v61 = vpop.permute.xlu1 %102  ;;  %v106_v62 = vpop.permute.xlu0 %105 }
  0xbb   :  { %vm121_vm13 = vcmp.eq.s32.totalorder %v103_v61, %v2326_v31  ;;  %vm122_vm14 = vcmp.eq.s32.totalorder %v106_v62, %v2326_v31 }
  0xbc   :  { %vm1583_vm15 = vmpackc.low %vm122_vm14, %vm121_vm13 }
  0xbd   :  { %1806 = vmatmul.mubr.msk.bf16.gmra.mxu0 %vm1583_vm15, %v2096_v34 }
  0xbf   :  { %v786_v9 = vpop.permute.xlu1 %785  ;;  %v789_v26 = vpop.permute.xlu0 %788 }
  0xc0   :  { %vm832_vm1 = vcmp.eq.s32.totalorder %v786_v9, %v2326_v31  ;;  %vm833_vm2 = vcmp.eq.s32.totalorder %v789_v26, %v2326_v31 }
  0xc1   :  { %vm1651_vm3 = vmpackc.low %vm833_vm2, %vm832_vm1 }
  0xc3   :  { %v792_v16 = vpop.permute.xlu1 %791 }
  0xc4   :  { %vm834_vm4 = vcmp.eq.s32.totalorder %v792_v16, %v2326_v31 }
  0xc7   :  { %v795_v22 = vpop.permute.xlu1 %794 }
  0xc8   :  { %vm835_vm5 = vcmp.eq.s32.totalorder %v795_v22, %v2326_v31 }
  0xc9   :  { %vm1653_vm8 = vmpackc.low %vm835_vm5, %vm834_vm4 }
 0x146   :  { %v1827_v0 = vpop.f32.mrf.mxu1 }
 0x148   :  { %v456_v1 = vpop.f32.mrf.mxu1 }
 0x14a   :  { %v1828_v2 = vpop.f32.mrf.mxu1 }
 0x14b   :  { %v520_v5 = vpack.c.bf16 %v1828_v2, %v1827_v0  ;;  %v1998_v2 = vld [vmem:[%s2636_s2 + $0x10] sm:$0xff]  }
 0x14c   :  { %v459_v3 = vpop.f32.mrf.mxu1  ;;  %1909 = vmatprep.subr.bf16.mxu1 %v1998_v2 }
 0x14d   :  { %v519_v4 = vpack.c.bf16 %v459_v3, %v456_v1  ;;  %v1999_v3 = vld [vmem:[%s2638_s4 + $0x38] sm:$0xff]  }
 0x14e   :  { %v1831_v6 = vpop.f32.mrf.mxu1 }
 0x14f   :  { %1843 = vmatprep.mubr.msk.bf16.mxu0 %vm535_vm0, %v519_v4  ;;  %v2002_v4 = vld [vmem:[%s2638_s4 + $0x20] sm:$0xff]  }
 0x150   :  { %v472_v10 = vpop.f32.mrf.mxu1  ;;  %1844 = vmatmul.mubr.msk.bf16.vlgmr.msra.gmra.mxu0 %vm535_vm0, %v520_v5  ;;  %v2003_v5 = vld [vmem:[%s2638_s4 + $0x18] sm:$0xff]  }
 0x151   :  { %1878 = vmatpush3.bf16.msra.mxu0 %v2172_v7 }
 0x152   :  { %v1832_v12 = vpop.f32.mrf.mxu1  ;;  %1879 = vmatprep.subr.bf16.mxu0 %v2177_v8 }
 0x153   :  { %v522_v18 = vpack.c.bf16 %v1832_v12, %v1831_v6 }
 0x154   :  { %v475_v13 = vpop.f32.mrf.mxu1 }
 0x155   :  { %v521_v15 = vpack.c.bf16 %v475_v13, %v472_v10  ;;  %1880 = vmatpush3.bf16.msra.mxu0 %v2177_v8 }
 0x156   :  { %v1835_v19 = vpop.f32.mrf.mxu1  ;;  %1881 = vmatprep.subr.bf16.mxu0 %v2199_v11 }
 0x157   :  { %1847 = vmatprep.mubr.msk.bf16.mxu0 %vm535_vm0, %v521_v15 }
 0x158   :  { %v488_v21 = vpop.f32.mrf.mxu1  ;;  %1848 = vmatmul.mubr.msk.bf16.gmra.mxu0 %vm535_vm0, %v522_v18 }
 0x159   :  { %1882 = vmatpush3.bf16.msra.mxu0 %v2199_v11  ;;  %v801_v11 = vpop.permute.xlu1 %800 }
 0x15a   :  { %v1836_v7 = vpop.f32.mrf.mxu1  ;;  %1883 = vmatprep.subr.bf16.mxu0 %v2216_v14  ;;  %vm837_vm6 = vcmp.eq.s32.totalorder %v801_v11, %v2326_v31 }
 0x15b   :  { %v524_v8 = vpack.c.bf16 %v1836_v7, %v1835_v19 }
 0x15c   :  { %v491_v25 = vpop.f32.mrf.mxu1 }
 0x15d   :  { %v523_v27 = vpack.c.bf16 %v491_v25, %v488_v21  ;;  %1884 = vmatpush3.bf16.msra.mxu0 %v2216_v14  ;;  %v798_v14 = vpop.permute.xlu0 %797  ;;  %v807_v37 = vpop.permute.xlu1 %806 }
 0x15e   :  { %v1839_v28 = vpop.f32.mrf.mxu1  ;;  %1885 = vmatprep.subr.bf16.mxu0 %v2237_v17  ;;  %vm836_vm7 = vcmp.eq.s32.totalorder %v798_v14, %v2326_v31  ;;  %vm839_vm10 = vcmp.eq.s32.totalorder %v807_v37, %v2326_v31 }
 0x15f   :  { %1851 = vmatprep.mubr.msk.bf16.mxu0 %vm535_vm0, %v523_v27  ;;  %vm1655_vm9 = vmpackc.low %vm837_vm6, %vm836_vm7 }
 0x160   :  { %v504_v29 = vpop.f32.mrf.mxu1  ;;  %1852 = vmatmul.mubr.msk.bf16.gmra.mxu0 %vm535_vm0, %v524_v8 }
 0x161   :  { %1886 = vmatpush3.bf16.msra.mxu0 %v2237_v17  ;;  %v804_v38 = vpop.permute.xlu0 %803 }
 0x162   :  { %v1840_v30 = vpop.f32.mrf.mxu1  ;;  %1887 = vmatprep.subr.bf16.mxu0 %v2260_v20  ;;  %vm838_vm11 = vcmp.eq.s32.totalorder %v804_v38, %v2326_v31 }
 0x163   :  { %v526_v36 = vpack.c.bf16 %v1840_v30, %v1839_v28  ;;  %vm1657_vm14 = vmpackc.low %vm839_vm10, %vm838_vm11 }
 0x164   :  { %v507_v32 = vpop.f32.mrf.mxu1 }
 0x165   :  { %v525_v33 = vpack.c.bf16 %v507_v32, %v504_v29  ;;  %1888 = vmatpush3.bf16.msra.mxu0 %v2260_v20  ;;  %v1795_v35 = vpop.f32.mrf.mxu0  ;;  %v810_v43 = vpop.permute.xlu0 %809 }
 0x166   :  { %1889 = vmatprep.subr.bf16.mxu0 %v2276_v23  ;;  %vm840_vm13 = vcmp.eq.s32.totalorder %v810_v43, %v2326_v31 }
 0x167   :  { %1855 = vmatprep.mubr.msk.bf16.mxu0 %vm535_vm0, %v525_v33  ;;  %v245_v17 = vpop.f32.mrf.mxu0 }
 0x168   :  { %1856 = vmatmul.mubr.msk.bf16.gmra.mxu0 %vm535_vm0, %v526_v36 }
 0x169   :  { %1890 = vmatpush3.bf16.msra.mxu0 %v2276_v23  ;;  %1893 = vmatprep.mubr.msk.bf16.mxu0 %vm1651_vm3, %v2096_v34  ;;  %v1796_v39 = vpop.f32.mrf.mxu0  ;;  %v813_v23 = vpop.permute.xlu1 %812 }
 0x16a   :  { %1891 = vmatprep.subr.bf16.mxu0 %v2286_v24  ;;  %v309_v20 = vpack.c.bf16 %v1796_v39, %v1795_v35  ;;  %vm841_vm12 = vcmp.eq.s32.totalorder %v813_v23, %v2326_v31  ;;  %v816_v49 = vpop.permute.xlu0 %815 }
 0x16b   :  { %v248_v40 = vpop.f32.mrf.mxu0  ;;  %vm1659_vm15 = vmpackc.low %vm841_vm12, %vm840_vm13  ;;  %vm842_vm2 = vcmp.eq.s32.totalorder %v816_v49, %v2326_v31  ;;  %v2005_v49 = vld [vmem:[%s2638_s4 + $0x8] sm:$0xff]  }
 0x16c   :  { %v308_v41 = vpack.c.bf16 %v248_v40, %v245_v17 }
 0x16d   :  { %1892 = vmatpush3.bf16.msra.mxu0 %v2286_v24  ;;  %v1799_v42 = vpop.f32.mrf.mxu0  ;;  %v819_v24 = vpop.permute.xlu1 %818 }
 0x16e   :  { %1861 = vmatprep.mubr.msk.bf16.mxu1 %vm535_vm0, %v308_v41  ;;  %v822_v54 = vpop.permute.xlu0 %821  ;;  %vm843_vm1 = vcmp.eq.s32.totalorder %v819_v24, %v2326_v31  ;;  %1927 = vmatprep.subr.bf16.mxu0 %v1999_v3 }
 0x16f   :  { %v261_v44 = vpop.f32.mrf.mxu0  ;;  %1862 = vmatmul.mubr.msk.bf16.vlgmr.msra.gmra.mxu1 %vm535_vm0, %v309_v20  ;;  %vm844_vm4 = vcmp.eq.s32.totalorder %v822_v54, %v2326_v31  ;;  %vm1661_vm5 = vmpackc.low %vm843_vm1, %vm842_vm2 }
 0x170   :  { %1894 = vmatmul.mubr.msk.bf16.vlgmr.msra.gmra.mxu0 %vm1653_vm8, %v2096_v34  ;;  %1910 = vmatpush3.bf16.msra.mxu1 %v1998_v2 }
 0x171   :  { %1897 = vmatprep.mubr.msk.bf16.mxu0 %vm1655_vm9, %v2096_v34  ;;  %v1800_v45 = vpop.f32.mrf.mxu0  ;;  %v825_v53 = vpop.permute.xlu1 %824  ;;  %1959 = vmatprep.subr.bf16.mxu1 %v1999_v3 }
 0x172   :  { %v311_v46 = vpack.c.bf16 %v1800_v45, %v1799_v42  ;;  %vm845_vm3 = vcmp.eq.s32.totalorder %v825_v53, %v2326_v31  ;;  %v828_v61 = vpop.permute.xlu0 %827  ;;  %1928 = vmatpush3.bf16.msra.mxu0 %v1999_v3 }
 0x173   :  { %v264_v47 = vpop.f32.mrf.mxu0  ;;  %vm1663_vm6 = vmpackc.low %vm845_vm3, %vm844_vm4  ;;  %vm846_vm8 = vcmp.eq.s32.totalorder %v828_v61, %v2326_v31 }
 0x174   :  { %v310_v48 = vpack.c.bf16 %v264_v47, %v261_v44 }
 0x175   :  { %v1803_v50 = vpop.f32.mrf.mxu0  ;;  %v831_v60 = vpop.permute.xlu1 %830 }
 0x176   :  { %1865 = vmatprep.mubr.msk.bf16.mxu1 %vm535_vm0, %v310_v48  ;;  %vm847_vm7 = vcmp.eq.s32.totalorder %v831_v60, %v2326_v31  ;;  %v2000_v31 = vld [vmem:[%s2638_s4 + $0x30] sm:$0xff]  }
 0x177   :  { %v277_v51 = vpop.f32.mrf.mxu0  ;;  %1866 = vmatmul.mubr.msk.bf16.gmra.mxu1 %vm535_vm0, %v311_v46  ;;  %vm1665_vm9 = vmpackc.low %vm847_vm7, %vm846_vm8  ;;  %1929 = vmatprep.subr.bf16.mxu0 %v2000_v31  ;;  %v2004_v48 = vld [vmem:[%s2638_s4 + $0x10] sm:$0xff]  }
 0x178   :  { %1898 = vmatmul.mubr.msk.bf16.gmra.mxu0 %vm1657_vm14, %v2096_v34 }
 0x179   :  { %1901 = vmatprep.mubr.msk.bf16.mxu0 %vm1659_vm15, %v2096_v34  ;;  %v1804_v52 = vpop.f32.mrf.mxu0  ;;  %1930 = vmatpush3.bf16.msra.mxu0 %v2000_v31 }
 0x17a   :  { %v313_v55 = vpack.c.bf16 %v1804_v52, %v1803_v50  ;;  %v2006_v50 = vld [vmem:[%s2638_s4] sm:$0xff]  }
 0x17b   :  { %v280_v56 = vpop.f32.mrf.mxu0 }
 0x17c   :  { %v312_v57 = vpack.c.bf16 %v280_v56, %v277_v51 }
 0x17d   :  { %v1807_v58 = vpop.f32.mrf.mxu0 }
 0x17e   :  { %1869 = vmatprep.mubr.msk.bf16.mxu1 %vm535_vm0, %v312_v57 }
 0x17f   :  { %v293_v59 = vpop.f32.mrf.mxu0  ;;  %1870 = vmatmul.mubr.msk.bf16.gmra.mxu1 %vm535_vm0, %v313_v55 }
 0x180   :  { %1902 = vmatmul.mubr.msk.bf16.gmra.mxu0 %vm1661_vm5, %v2096_v34 }
 0x181   :  { %1905 = vmatprep.mubr.msk.bf16.mxu0 %vm1663_vm6, %v2096_v34  ;;  %v1808_v62 = vpop.f32.mrf.mxu0 }
 0x182   :  { %v315_v63 = vpack.c.bf16 %v1808_v62, %v1807_v58 }
 0x183   :  { %v296_v0 = vpop.f32.mrf.mxu0 }
 0x184   :  { %v314_v1 = vpack.c.bf16 %v296_v0, %v293_v59 }
 0x186   :  { %1873 = vmatprep.mubr.msk.bf16.mxu1 %vm535_vm0, %v314_v1 }
 0x187   :  { %1874 = vmatmul.mubr.msk.bf16.gmra.mxu1 %vm535_vm0, %v315_v63 }
 0x188   :  { %1906 = vmatmul.mubr.msk.bf16.gmra.mxu0 %vm1665_vm9, %v2096_v34  ;;  %v2001_v34 = vld [vmem:[%s2638_s4 + $0x28] sm:$0xff]  }
 0x189   :  { %1931 = vmatprep.subr.bf16.mxu0 %v2001_v34 }
 0x18a   :  { %1932 = vmatpush3.bf16.msra.mxu0 %v2001_v34 }
 0x18b   :  { %1933 = vmatprep.subr.bf16.mxu0 %v2002_v4 }
 0x18e   :  { %1934 = vmatpush3.bf16.msra.mxu0 %v2002_v4 }
 0x18f   :  { %1935 = vmatprep.subr.bf16.mxu0 %v2003_v5 }
 0x192   :  { %1936 = vmatpush3.bf16.msra.mxu0 %v2003_v5 }
 0x193   :  { %1937 = vmatprep.subr.bf16.mxu0 %v2004_v48 }
 0x196   :  { %1938 = vmatpush3.bf16.msra.mxu0 %v2004_v48 }
 0x197   :  { %1939 = vmatprep.subr.bf16.mxu0 %v2005_v49 }
 0x19a   :  { %1940 = vmatpush3.bf16.msra.mxu0 %v2005_v49 }
 0x19b   :  { %1941 = vmatprep.subr.bf16.mxu0 %v2006_v50 }
 0x19e   :  { %1942 = vmatpush3.bf16.msra.mxu0 %v2006_v50 }
 0x210   :  { %v2454_v6 = vpop.f32.mrf.mxu0 }
 0x212   :  { %v2456_v9 = vpop.f32.mrf.mxu0 }
 0x214   :  { %v2458_v10 = vpop.f32.mrf.mxu0 }
 0x216   :  { %v2460_v12 = vpop.f32.mrf.mxu0 }
 0x218   :  { %v2462_v13 = vpop.f32.mrf.mxu0 }
 0x21a   :  { %v2464_v15 = vpop.f32.mrf.mxu0 }
 0x21c   :  { %v2466_v16 = vpop.f32.mrf.mxu0 }
 0x21e   :  { %v2468_v18 = vpop.f32.mrf.mxu0 }
 0x220   :  { %v2470_v19 = vpop.f32.mrf.mxu0 }
 0x222   :  { %v2472_v21 = vpop.f32.mrf.mxu0 }
 0x224   :  { %v2474_v7 = vpop.f32.mrf.mxu0 }
 0x226   :  { %v2476_v22 = vpop.f32.mrf.mxu0 }
 0x228   :  { %v2478_v25 = vpop.f32.mrf.mxu0 }
 0x22a   :  { %v2480_v26 = vpop.f32.mrf.mxu0 }
 0x22c   :  { %v2482_v27 = vpop.f32.mrf.mxu0 }
 0x22e   :  { %v2484_v8 = vpop.f32.mrf.mxu0 }
 0x22f   :  { %v1863_v51 = vpop.f32.mrf.mxu1 }
 0x230   :  { %v1895_v28 = vpop.f32.mrf.mxu0 }
 0x231   :  { %v721_v52 = vpop.f32.mrf.mxu1 }
 0x232   :  { %v922_v29 = vpop.f32.mrf.mxu0 }
 0x233   :  { %v1864_v53 = vpop.f32.mrf.mxu1 }
 0x234   :  { %v1896_v11 = vpop.f32.mrf.mxu0 }
 0x235   :  { %v986_v32 = vpack.c.bf16 %v1896_v11, %v1895_v28  ;;  %v724_v54 = vpop.f32.mrf.mxu1 }
 0x236   :  { %v925_v30 = vpop.f32.mrf.mxu0 }
 0x237   :  { %v985_v14 = vpack.c.bf16 %v925_v30, %v922_v29  ;;  %v1867_v55 = vpop.f32.mrf.mxu1  ;;  %v733_v29 = vadd.f32 %v1864_v53, %v2458_v10 }
 0x238   :  { %v1899_v33 = vpop.f32.mrf.mxu0 }
 0x239   :  { %1911 = vmatprep.mubr.msk.bf16.mxu1 %vm535_vm0, %v985_v14  ;;  %v737_v56 = vpop.f32.mrf.mxu1  ;;  %v725_v14 = vadd.f32 %v724_v54, %v2460_v12 }
 0x23a   :  { %v938_v35 = vpop.f32.mrf.mxu0  ;;  %1912 = vmatmul.mubr.msk.bf16.vlgmr.msra.gmra.mxu1 %vm535_vm0, %v986_v32 }
 0x23b   :  { %1967 = vmatpush3.bf16.msra.mxu1 %v1999_v3  ;;  %v1868_v57 = vpop.f32.mrf.mxu1  ;;  %v730_v3 = vadd.f32 %v1863_v51, %v2454_v6 }
 0x23c   :  { %v1900_v36 = vpop.f32.mrf.mxu0  ;;  %1960 = vmatprep.subr.bf16.mxu1 %v2000_v31  ;;  %v749_v12 = vadd.f32 %v1868_v57, %v2466_v16 }
 0x23d   :  { %v988_v38 = vpack.c.bf16 %v1900_v36, %v1899_v33  ;;  %v740_v58 = vpop.f32.mrf.mxu1 }
 0x23e   :  { %v941_v17 = vpop.f32.mrf.mxu0 }
 0x23f   :  { %v987_v37 = vpack.c.bf16 %v941_v17, %v938_v35  ;;  %1968 = vmatpush3.bf16.msra.mxu1 %v2000_v31  ;;  %v1871_v59 = vpop.f32.mrf.mxu1  ;;  %v746_v35 = vadd.f32 %v1867_v55, %v2462_v13 }
 0x240   :  { %v1903_v39 = vpop.f32.mrf.mxu0  ;;  %1961 = vmatprep.subr.bf16.mxu1 %v2001_v34 }
 0x241   :  { %1915 = vmatprep.mubr.msk.bf16.mxu1 %vm535_vm0, %v987_v37  ;;  %v753_v60 = vpop.f32.mrf.mxu1  ;;  %v738_v37 = vadd.f32 %v737_v56, %v2464_v15 }
 0x242   :  { %v954_v20 = vpop.f32.mrf.mxu0  ;;  %1916 = vmatmul.mubr.msk.bf16.gmra.mxu1 %vm535_vm0, %v988_v38  ;;  %v754_v51 = vadd.f32 %v753_v60, %v2472_v21 }
 0x243   :  { %1969 = vmatpush3.bf16.msra.mxu1 %v2001_v34  ;;  %v1872_v61 = vpop.f32.mrf.mxu1  ;;  %v722_v34 = vadd.f32 %v721_v52, %v2456_v9 }
 0x244   :  { %v1904_v40 = vpop.f32.mrf.mxu0  ;;  %1962 = vmatprep.subr.bf16.mxu1 %v2002_v4  ;;  %v765_v56 = vadd.f32 %v1872_v61, %v2474_v7 }
 0x245   :  { %v990_v23 = vpack.c.bf16 %v1904_v40, %v1903_v39  ;;  %v756_v62 = vpop.f32.mrf.mxu1 }
 0x246   :  { %v957_v41 = vpop.f32.mrf.mxu0 }
 0x247   :  { %v989_v42 = vpack.c.bf16 %v957_v41, %v954_v20  ;;  %1970 = vmatpush3.bf16.msra.mxu1 %v2002_v4  ;;  %v2503_v63 = vpop.f32.mrf.mxu1 }
 0x248   :  { %v1907_v43 = vpop.f32.mrf.mxu0  ;;  %1963 = vmatprep.subr.bf16.mxu1 %v2003_v5 }
 0x249   :  { %1919 = vmatprep.mubr.msk.bf16.mxu1 %vm535_vm0, %v989_v42  ;;  %v2505_v0 = vpop.f32.mrf.mxu1 }
 0x24a   :  { %v970_v44 = vpop.f32.mrf.mxu0  ;;  %1920 = vmatmul.mubr.msk.bf16.gmra.mxu1 %vm535_vm0, %v990_v23 }
 0x24b   :  { %1971 = vmatpush3.bf16.msra.mxu1 %v2003_v5  ;;  %v2507_v1 = vpop.f32.mrf.mxu1  ;;  %v2516_v5 = vld [vmem:[%s2637_s3] ss:$0 sm:$0xff] }
 0x24c   :  { %v1908_v45 = vpop.f32.mrf.mxu0  ;;  %1964 = vmatprep.subr.bf16.mxu1 %v2004_v48 }
 0x24d   :  { %v992_v24 = vpack.c.bf16 %v1908_v45, %v1907_v43  ;;  %v2509_v2 = vpop.f32.mrf.mxu1  ;;  %v741_v45 = vadd.f32 %v740_v58, %v2468_v18 }
 0x24e   :  { %v973_v46 = vpop.f32.mrf.mxu0 }
 0x24f   :  { %v991_v47 = vpack.c.bf16 %v973_v46, %v970_v44  ;;  %1972 = vmatpush3.bf16.msra.mxu1 %v2004_v48  ;;  %v762_v48 = vadd.f32 %v1871_v59, %v2470_v19 }
 0x250   :  { %1965 = vmatprep.subr.bf16.mxu1 %v2005_v49 }
 0x251   :  { %1923 = vmatprep.mubr.msk.bf16.mxu1 %vm535_vm0, %v991_v47 }
 0x252   :  { %1924 = vmatmul.mubr.msk.bf16.gmra.mxu1 %vm535_vm0, %v992_v24 }
 0x253   :  { %1973 = vmatpush3.bf16.msra.mxu1 %v2005_v49 }
 0x254   :  { %1966 = vmatprep.subr.bf16.mxu1 %v2006_v50 }
 0x257   :  { %1974 = vmatpush3.bf16.msra.mxu1 %v2006_v50 }
 0x2fa   :  { %v1913_v31 = vpop.f32.mrf.mxu1 }
 0x2fb   :  { %v1124_v4 = vadd.f32 %v1913_v31, %v730_v3 }
 0x2fc   :  { %v1059_v28 = vpop.f32.mrf.mxu1 }
 0x2fd   :  { %v1122_v11 = vadd.f32 %v1059_v28, %v722_v34  ;;  %v1147_v32 = vadd.f32 %v2516_v5, %v1124_v4  ;;  %v757_v34 = vadd.f32 %v756_v62, %v2476_v22 }
 0x2fe   :  { %v1914_v30 = vpop.f32.mrf.mxu1 }
 0x2ff   :  { %v1125_v33 = vadd.f32 %v1914_v30, %v733_v29  ;;  %v1145_v9 = vadd.f32 %v2516_v5, %v1122_v11  ;;  %v1163_v39 = vmax.f32 %v1147_v32, 0.0  ;;  %v778_v29 = vadd.f32 %v2503_v63, %v2478_v25 }
 0x300   :  { %v1062_v6 = vpop.f32.mrf.mxu1  ;;  %v770_v30 = vadd.f32 %v2505_v0, %v2480_v26 }
 0x301   :  { %v1148_v36 = vadd.f32 %v2516_v5, %v1125_v33  ;;  %v1123_v17 = vadd.f32 %v1062_v6, %v725_v14  ;;  %v1161_v42 = vmax.f32 %v1145_v9, 0.0  ;;  %v781_v6 = vadd.f32 %v2507_v1, %v2482_v27 }
 0x302   :  { %v1917_v38 = vpop.f32.mrf.mxu1 }
 0x303   :  { %v1164_v10 = vmax.f32 %v1148_v36, 0.0  ;;  %v1146_v20 = vadd.f32 %v2516_v5, %v1123_v17  ;;  %v1128_v40 = vadd.f32 %v1917_v38, %v746_v35 }
 0x304   :  { %v1075_v41 = vpop.f32.mrf.mxu1 }
 0x305   :  { %v1178_v23 = vpack.c.bf16 %v1164_v10, %v1163_v39  ;;  %v1162_v43 = vmax.f32 %v1146_v20, 0.0  ;;  %v1126_v13 = vadd.f32 %v1075_v41, %v738_v37  ;;  %v1151_v46 = vadd.f32 %v2516_v5, %v1128_v40 }
 0x306   :  { %v1918_v44 = vpop.f32.mrf.mxu1  ;;  %v773_v37 = vadd.f32 %v2509_v2, %v2484_v8  ;;  %v1677_v2 = vld [vmem:[%s2639_s5] ss:$0 sm:$0xff]  ;;  %s2097_s5 = smov [#allocation2]  }
 0x307   :  { %v1129_v47 = vadd.f32 %v1918_v44, %v749_v12  ;;  %v1177_v15 = vpack.c.bf16 %v1162_v43, %v1161_v42  ;;  %v1149_v49 = vadd.f32 %v2516_v5, %v1126_v13  ;;  %v1167_v53 = vmax.f32 %v1151_v46, 0.0  ;;  %s1534_s18 = sshll.u32 %s2097_s5, 4  ;;  %s1535_s18 = int_to_ptr.vmem [resolvable:$true] %s1534_s18 }
 0x308   :  { %v1078_v24 = vpop.f32.mrf.mxu1  ;;  %s2071_s0 = scalar_lea.vmem %s1535_s18, 2048  ;;  %p2076_p1 = scmp.lt.s32.totalorder %s1535_s18, %s1535_s18 }
 0x309   :  { %v1152_v50 = vadd.f32 %v2516_v5, %v1129_v47  ;;  %v1127_v16 = vadd.f32 %v1078_v24, %v741_v45  ;;  %1943 = vmatprep.mubr.bf16.mxu0 %v1177_v15  ;;  %v1165_v58 = vmax.f32 %v1149_v49, 0.0  ;;  %p2072_p0 = scmp.ne.s32.totalorder %s1535_s18, %s2071_s0  ;;  %p2077_p2 = scmp.lt.s32.totalorder %s2071_s0, %s2071_s0 }
 0x30a   :  { %v1921_v52 = vpop.f32.mrf.mxu1  ;;  %1944 = vmatmul.mubr.bf16.vlgmr.msra.gmra.mxu0 %v1178_v23 }
 0x30b   :  { %v1168_v54 = vmax.f32 %v1152_v50, 0.0  ;;  %v1150_v18 = vadd.f32 %v2516_v5, %v1127_v16  ;;  %v1132_v55 = vadd.f32 %v1921_v52, %v762_v48  ;;  %p2078_p3 = por %p2077_p2, %p2076_p1 }
 0x30c   :  { %v1091_v57 = vpop.f32.mrf.mxu1 }
 0x30d   :  { %v1166_v19 = vmax.f32 %v1150_v18, 0.0  ;;  %v1130_v59 = vadd.f32 %v1091_v57, %v754_v51  ;;  %v1180_v3 = vpack.c.bf16 %v1168_v54, %v1167_v53  ;;  %v1155_v4 = vadd.f32 %v2516_v5, %v1132_v55  ;;  %p2079_p4 = pnand %p2078_p3, %p2072_p0 }
 0x30e   :  { %v1922_v31 = vpop.f32.mrf.mxu1 }
 0x30f   :  { %v1133_v21 = vadd.f32 %v1922_v31, %v765_v56  ;;  %v1179_v60 = vpack.c.bf16 %v1166_v19, %v1165_v58  ;;  %v1153_v11 = vadd.f32 %v2516_v5, %v1130_v59  ;;  %v1171_v22 = vmax.f32 %v1155_v4, 0.0 }
 0x310   :  { %v1094_v28 = vpop.f32.mrf.mxu1 }
 0x311   :  { %v1156_v7 = vadd.f32 %v2516_v5, %v1133_v21  ;;  %v1131_v61 = vadd.f32 %v1094_v28, %v757_v34  ;;  %1947 = vmatprep.mubr.bf16.mxu0 %v1179_v60  ;;  %v1169_v63 = vmax.f32 %v1153_v11, 0.0 }
 0x312   :  { %v1925_v14 = vpop.f32.mrf.mxu1  ;;  %1948 = vmatmul.mubr.bf16.gmra.mxu0 %v1180_v3 }
 0x313   :  { %v1172_v62 = vmax.f32 %v1156_v7, 0.0  ;;  %v1154_v32 = vadd.f32 %v2516_v5, %v1131_v61  ;;  %v1136_v33 = vadd.f32 %v1925_v14, %v778_v29 }
 0x314   :  { %v1107_v25 = vpop.f32.mrf.mxu1 }
 0x315   :  { %v1182_v35 = vpack.c.bf16 %v1172_v62, %v1171_v22  ;;  %v1170_v9 = vmax.f32 %v1154_v32, 0.0  ;;  %v1134_v36 = vadd.f32 %v1107_v25, %v770_v30  ;;  %v1159_v26 = vadd.f32 %v2516_v5, %v1136_v33 }
 0x316   :  { %v1926_v17 = vpop.f32.mrf.mxu1 }
 0x317   :  { %v1137_v0 = vadd.f32 %v1926_v17, %v781_v6  ;;  %v1181_v38 = vpack.c.bf16 %v1170_v9, %v1169_v63  ;;  %v1157_v10 = vadd.f32 %v2516_v5, %v1134_v36  ;;  %v1175_v27 = vmax.f32 %v1159_v26, 0.0 }
 0x318   :  { %v1110_v39 = vpop.f32.mrf.mxu1 }
 0x319   :  { %v1160_v20 = vadd.f32 %v2516_v5, %v1137_v0  ;;  %v1135_v40 = vadd.f32 %v1110_v39, %v773_v37  ;;  %1951 = vmatprep.mubr.bf16.mxu1 %v1181_v38  ;;  %v1173_v41 = vmax.f32 %v1157_v10, 0.0 }
 0x31a   :  { %1952 = vmatmul.mubr.bf16.vlgmr.msra.gmra.mxu1 %v1182_v35 }
 0x31b   :  { %v1176_v1 = vmax.f32 %v1160_v20, 0.0  ;;  %v1158_v12 = vadd.f32 %v2516_v5, %v1135_v40 }
 0x31d   :  { %v1174_v42 = vmax.f32 %v1158_v12, 0.0  ;;  %v1184_v23 = vpack.c.bf16 %v1176_v1, %v1175_v27 }
 0x31f   :  { %v1183_v8 = vpack.c.bf16 %v1174_v42, %v1173_v41 }
 0x321   :  { %1955 = vmatprep.mubr.bf16.mxu1 %v1183_v8 }
 0x322   :  { %1956 = vmatmul.mubr.bf16.gmra.mxu1 %v1184_v23 }
 0x3ca   :  { %v1945_v43 = vpop.f32.mrf.mxu0 }
 0x3cb   :  { %v1299_v13 = vadd.f32 %v1945_v43, %v1677_v2 }
 0x3cc   :  { %v1290_v44 = vpop.f32.mrf.mxu0 }
 0x3cd   :  { %1357 = vmax.xlane.f32.xlu0 %v1299_v13  ;;  %v1291_v46 = vadd.f32 %v1677_v2, %v1290_v44 }
 0x3ce   :  { %v1946_v45 = vpop.f32.mrf.mxu0 }
 0x3cf   :  { %v1302_v24 = vadd.f32 %v1946_v45, %v1677_v2 }
 0x3d0   :  { %v1293_v47 = vpop.f32.mrf.mxu0 }
 0x3d1   :  { %v1294_v15 = vadd.f32 %v1677_v2, %v1293_v47  ;;  %1353 = vmax.xlane.f32.xlu0 %v1291_v46 }
 0x3d2   :  { %v1949_v5 = vpop.f32.mrf.mxu0 }
 0x3d3   :  { %1355 = vmax.xlane.f32.xlu1 %v1294_v15  ;;  %v1315_v49 = vadd.f32 %v1949_v5, %v1677_v2 }
 0x3d4   :  { %v1306_v48 = vpop.f32.mrf.mxu0 }
 0x3d5   :  { %1359 = vmax.xlane.f32.xlu0 %v1302_v24  ;;  %v1307_v52 = vadd.f32 %v1677_v2, %v1306_v48 }
 0x3d6   :  { %v1950_v50 = vpop.f32.mrf.mxu0 }
 0x3d7   :  { %v1318_v16 = vadd.f32 %v1950_v50, %v1677_v2  ;;  %1365 = vmax.xlane.f32.xlu1 %v1315_v49 }
 0x3d8   :  { %v1309_v51 = vpop.f32.mrf.mxu0 }
 0x3d9   :  { %1367 = vmax.xlane.f32.xlu0 %v1318_v16  ;;  %v1310_v54 = vadd.f32 %v1677_v2, %v1309_v51 }
 0x3da   :  { %v1953_v53 = vpop.f32.mrf.mxu1 }
 0x3db   :  { %1361 = vmax.xlane.f32.xlu1 %v1307_v52  ;;  %v1331_v55 = vadd.f32 %v1953_v53, %v1677_v2 }
 0x3dc   :  { %v1322_v18 = vpop.f32.mrf.mxu1 }
 0x3dd   :  { %1363 = vmax.xlane.f32.xlu0 %v1310_v54  ;;  %v1323_v19 = vadd.f32 %v1677_v2, %v1322_v18 }
 0x3de   :  { %v1954_v56 = vpop.f32.mrf.mxu1 }
 0x3df   :  { %v1334_v57 = vadd.f32 %v1954_v56, %v1677_v2  ;;  %1373 = vmax.xlane.f32.xlu1 %v1331_v55 }
 0x3e0   :  { %v1325_v58 = vpop.f32.mrf.mxu1 }
 0x3e1   :  { %1375 = vmax.xlane.f32.xlu0 %v1334_v57  ;;  %v1326_v3 = vadd.f32 %v1677_v2, %v1325_v58 }
 0x3e2   :  { %v1957_v59 = vpop.f32.mrf.mxu1 }
 0x3e3   :  { %1369 = vmax.xlane.f32.xlu1 %v1323_v19  ;;  %v2555_v60 = vadd.f32 %v1957_v59, %v1677_v2 }
 0x3e4   :  { %v1338_v31 = vpop.f32.mrf.mxu1 }
 0x3e5   :  { %v1339_v34 = vadd.f32 %v1677_v2, %v1338_v31  ;;  %1371 = vmax.xlane.f32.xlu0 %v1326_v3 }
 0x3e6   :  { %v1958_v4 = vpop.f32.mrf.mxu1 }
 0x3e7   :  { %1377 = vmax.xlane.f32.xlu1 %v1339_v34  ;;  %v2561_v29 = vadd.f32 %v1958_v4, %v1677_v2 }
 0x3e8   :  { %v1341_v21 = vpop.f32.mrf.mxu1 }
 0x3e9   :  { %v2557_v28 = vadd.f32 %v1677_v2, %v1341_v21 }
 0x3eb   :  { %1379 = vmax.xlane.f32.xlu0 %v2557_v28  ;;  %1381 = vmax.xlane.f32.xlu1 %v2555_v60 }
 0x3ef   :  { %1383 = vmax.xlane.f32.xlu0 %v2561_v29 }
 0x456   :  { %v1358_v11 = vpop.xlane.xlu0 %1357 }
 0x457   :  { %v2564_v7 = vsub.f32 %v1299_v13, %v1358_v11 }
 0x459   :  { %v1405_v61 = vmul.f32 1.442695, %v2564_v7 }
 0x45a   :  { %v1354_v30 = vpop.xlane.xlu0 %1353 }
 0x45b   :  { %2007 = vpow2.f32 %v1405_v61  ;;  %v2567_v14 = vsub.f32 %v1291_v46, %v1354_v30 }
 0x45c   :  { %v1356_v22 = vpop.xlane.xlu1 %1355 }
 0x45d   :  { %v1401_v62 = vmul.f32 1.442695, %v2567_v14  ;;  %v2570_v33 = vsub.f32 %v1294_v15, %v1356_v22 }
 0x45e   :  { %v1360_v32 = vpop.xlane.xlu0 %1359 }
 0x45f   :  { %2009 = vpow2.f32 %v1401_v62  ;;  %v2572_v6 = vsub.f32 %v1302_v24, %v1360_v32  ;;  %v1403_v36 = vmul.f32 1.442695, %v2570_v33 }
 0x460   :  { %v1366_v25 = vpop.xlane.xlu1 %1365 }
 0x461   :  { %v1407_v63 = vmul.f32 1.442695, %v2572_v6  ;;  %v2575_v35 = vsub.f32 %v1315_v49, %v1366_v25 }
 0x462   :  { %v1368_v9 = vpop.xlane.xlu0 %1367 }
 0x463   :  { %2011 = vpow2.f32 %v1407_v63  ;;  %v1413_v17 = vmul.f32 1.442695, %v2575_v35  ;;  %v2579_v37 = vsub.f32 %v1318_v16, %v1368_v9 }
 0x464   :  { %v1362_v26 = vpop.xlane.xlu1 %1361 }
 0x465   :  { %2013 = vpow2.f32 %v1413_v17  ;;  %v2581_v0 = vsub.f32 %v1307_v52, %v1362_v26  ;;  %v1415_v39 = vmul.f32 1.442695, %v2579_v37 }
 0x466   :  { %v1364_v38 = vpop.xlane.xlu0 %1363  ;;  %2015 = vpow2.f32 %v1403_v36 }
 0x467   :  { %v1409_v10 = vmul.f32 1.442695, %v2581_v0  ;;  %v2585_v20 = vsub.f32 %v1310_v54, %v1364_v38 }
 0x468   :  { %v2008_v40 = vpop.eup %2007  ;;  %v1374_v27 = vpop.xlane.xlu1 %1373 }
 0x469   :  { %2017 = vpow2.f32 %v1409_v10  ;;  %v2587_v1 = vsub.f32 %v1331_v55, %v1374_v27  ;;  %1437 = vadd.xlane.f32.xlu1 %v2008_v40  ;;  %v1411_v41 = vmul.f32 1.442695, %v2585_v20 }
 0x46a   :  { %v1376_v12 = vpop.xlane.xlu0 %1375  ;;  %2019 = vpow2.f32 %v1415_v39 }
 0x46b   :  { %v1421_v42 = vmul.f32 1.442695, %v2587_v1  ;;  %v2591_v23 = vsub.f32 %v1334_v57, %v1376_v12 }
 0x46c   :  { %v2010_v8 = vpop.eup %2009  ;;  %v1370_v2 = vpop.xlane.xlu1 %1369 }
 0x46d   :  { %2021 = vpow2.f32 %v1421_v42  ;;  %v2593_v43 = vsub.f32 %v1323_v19, %v1370_v2  ;;  %1433 = vadd.xlane.f32.xlu1 %v2010_v8  ;;  %v1423_v44 = vmul.f32 1.442695, %v2591_v23 }
 0x46e   :  { %v1372_v13 = vpop.xlane.xlu0 %1371  ;;  %2023 = vpow2.f32 %v1411_v41 }
 0x46f   :  { %v1417_v45 = vmul.f32 1.442695, %v2593_v43  ;;  %v2597_v46 = vsub.f32 %v1326_v3, %v1372_v13 }
 0x470   :  { %v2012_v47 = vpop.eup %2011  ;;  %v1378_v15 = vpop.xlane.xlu1 %1377 }
 0x471   :  { %2025 = vpow2.f32 %v1417_v45  ;;  %v2599_v5 = vsub.f32 %v1339_v34, %v1378_v15  ;;  %1439 = vadd.xlane.f32.xlu0 %v2012_v47  ;;  %v1419_v48 = vmul.f32 1.442695, %v2597_v46 }
 0x472   :  { %v2014_v24 = vpop.eup %2013  ;;  %2027 = vpow2.f32 %v1423_v44 }
 0x473   :  { %v1425_v49 = vmul.f32 1.442695, %v2599_v5  ;;  %1445 = vadd.xlane.f32.xlu1 %v2014_v24  ;;  %v2016_v50 = vpop.eup %2015 }
 0x474   :  { %v1380_v16 = vpop.xlane.xlu0 %1379  ;;  %v1382_v51 = vpop.xlane.xlu1 %1381 }
 0x475   :  { %2029 = vpow2.f32 %v1425_v49  ;;  %v2604_v52 = vsub.f32 %v2557_v28, %v1380_v16  ;;  %v2607_v53 = vsub.f32 %v2555_v60, %v1382_v51  ;;  %1435 = vadd.xlane.f32.xlu0 %v2016_v50 }
 0x476   :  { %v2018_v54 = vpop.eup %2017  ;;  %2031 = vpow2.f32 %v1419_v48 }
 0x477   :  { %v1427_v18 = vmul.f32 1.442695, %v2604_v52  ;;  %v1429_v55 = vmul.f32 1.442695, %v2607_v53  ;;  %1441 = vadd.xlane.f32.xlu1 %v2018_v54  ;;  %v2020_v56 = vpop.eup %2019 }
 0x478   :  { %v1384_v57 = vpop.xlane.xlu0 %1383 }
 0x479   :  { %v2612_v58 = vsub.f32 %v2561_v29, %v1384_v57  ;;  %1447 = vadd.xlane.f32.xlu0 %v2020_v56  ;;  %2033 = vpow2.f32 %v1429_v55 }
 0x47a   :  { %v2022_v19 = vpop.eup %2021  ;;  %2035 = vpow2.f32 %v1427_v18 }
 0x47b   :  { %v1431_v59 = vmul.f32 1.442695, %v2612_v58  ;;  %1453 = vadd.xlane.f32.xlu1 %v2022_v19  ;;  %v2024_v3 = vpop.eup %2023 }
 0x47d   :  { %1443 = vadd.xlane.f32.xlu0 %v2024_v3  ;;  %2037 = vpow2.f32 %v1431_v59 }
 0x47e   :  { %v2026_v31 = vpop.eup %2025 }
 0x47f   :  { %1449 = vadd.xlane.f32.xlu1 %v2026_v31  ;;  %v2028_v34 = vpop.eup %2027 }
 0x481   :  { %1455 = vadd.xlane.f32.xlu0 %v2028_v34 }
 0x482   :  { %v2030_v4 = vpop.eup %2029 }
 0x483   :  { %1457 = vadd.xlane.f32.xlu1 %v2030_v4  ;;  %v2032_v21 = vpop.eup %2031 }
 0x485   :  { %1451 = vadd.xlane.f32.xlu0 %v2032_v21 }
 0x486   :  { %v2034_v60 = vpop.eup %2033 }
 0x487   :  { %v2036_v28 = vpop.eup %2035  ;;  %1461 = vadd.xlane.f32.xlu1 %v2034_v60 }
 0x489   :  { %1459 = vadd.xlane.f32.xlu0 %v2036_v28 }
 0x48a   :  { %v2038_v29 = vpop.eup %2037 }
 0x48d   :  { %1463 = vadd.xlane.f32.xlu0 %v2038_v29 }
 0x4f2   :  { %v1438_v11 = vpop.xlane.xlu1 %1437 }
 0x4f3   :  { %2039 = vlog2.f32 %v1438_v11 }
 0x4f6   :  { %v1434_v61 = vpop.xlane.xlu1 %1433 }
 0x4f7   :  { %2041 = vlog2.f32 %v1434_v61 }
 0x4fa   :  { %v1440_v30 = vpop.xlane.xlu0 %1439 }
 0x4fb   :  { %2043 = vlog2.f32 %v1440_v30 }
 0x4fc   :  { %v1446_v22 = vpop.xlane.xlu1 %1445 }
 0x4fd   :  { %2045 = vlog2.f32 %v1446_v22 }
 0x4fe   :  { %v1436_v62 = vpop.xlane.xlu0 %1435 }
 0x4ff   :  { %2047 = vlog2.f32 %v1436_v62 }
 0x500   :  { %v2040_v32 = vpop.eup %2039  ;;  %v1442_v25 = vpop.xlane.xlu1 %1441 }
 0x501   :  { %v1470_v63 = vmul.f32 0.6931472, %v2040_v32  ;;  %2049 = vlog2.f32 %v1442_v25 }
 0x502   :  { %v1448_v9 = vpop.xlane.xlu0 %1447 }
 0x503   :  { %v1499_v36 = vsub.f32 %v2564_v7, %v1470_v63  ;;  %2051 = vlog2.f32 %v1448_v9 }
 0x504   :  { %v2042_v17 = vpop.eup %2041  ;;  %v1454_v26 = vpop.xlane.xlu1 %1453 }
 0x505   :  { %1515 = vst [vmem:[#allocation2 + $0x10] sm:$0xff] %v1499_v36  ;;  %v1466_v38 = vmul.f32 0.6931472, %v2042_v17  ;;  %2053 = vlog2.f32 %v1454_v26 }
 0x506   :  { %v1444_v39 = vpop.xlane.xlu0 %1443 }
 0x507   :  { %v1497_v10 = vsub.f32 %v2567_v14, %v1466_v38  ;;  %2055 = vlog2.f32 %v1444_v39 }
 0x508   :  { %v2044_v40 = vpop.eup %2043  ;;  %v1450_v27 = vpop.xlane.xlu1 %1449 }
 0x509   :  { %1513 = vst [vmem:[#allocation2] sm:$0xff] %v1497_v10  ;;  %v1472_v12 = vmul.f32 0.6931472, %v2044_v40  ;;  %2057 = vlog2.f32 %v1450_v27 }
 0x50a   :  { %v2046_v41 = vpop.eup %2045  ;;  %v1456_v42 = vpop.xlane.xlu0 %1455 }
 0x50b   :  { %v1500_v8 = vsub.f32 %v2572_v6, %v1472_v12  ;;  %v1478_v7 = vmul.f32 0.6931472, %v2046_v41  ;;  %2059 = vlog2.f32 %v1456_v42 }
 0x50c   :  { %v2048_v2 = vpop.eup %2047  ;;  %v1458_v13 = vpop.xlane.xlu1 %1457 }
 0x50d   :  { %1516 = vst [vmem:[#allocation2 + $0x18] sm:$0xff] %v1500_v8  ;;  %v1503_v44 = vsub.f32 %v2575_v35, %v1478_v7  ;;  %v1468_v45 = vmul.f32 0.6931472, %v2048_v2  ;;  %2061 = vlog2.f32 %v1458_v13 }
 0x50e   :  { %v2050_v14 = vpop.eup %2049  ;;  %v1452_v47 = vpop.xlane.xlu0 %1451 }
 0x50f   :  { %1519 = vst [vmem:[#allocation2 + $0x30] sm:$0xff] %v1503_v44  ;;  %v1498_v15 = vsub.f32 %v2570_v33, %v1468_v45  ;;  %v1474_v24 = vmul.f32 0.6931472, %v2050_v14  ;;  %2063 = vlog2.f32 %v1452_v47 }
 0x510   :  { %v2052_v48 = vpop.eup %2051  ;;  %v1462_v50 = vpop.xlane.xlu1 %1461 }
 0x511   :  { %1514 = vst [vmem:[#allocation2 + $0x8] sm:$0xff] %v1498_v15  ;;  %v1501_v6 = vsub.f32 %v2581_v0, %v1474_v24  ;;  %v1480_v49 = vmul.f32 0.6931472, %v2052_v48  ;;  %2065 = vlog2.f32 %v1462_v50 }
 0x512   :  { %v2054_v16 = vpop.eup %2053  ;;  %v1460_v51 = vpop.xlane.xlu0 %1459 }
 0x513   :  { %1517 = vst [vmem:[#allocation2 + $0x20] sm:$0xff] %v1501_v6  ;;  %v1504_v35 = vsub.f32 %v2579_v37, %v1480_v49  ;;  %v1486_v54 = vmul.f32 0.6931472, %v2054_v16  ;;  %2067 = vlog2.f32 %v1460_v51 }
 0x514   :  { %v2056_v18 = vpop.eup %2055 }
 0x515   :  { %1520 = vst [vmem:[#allocation2 + $0x38] sm:$0xff] %v1504_v35  ;;  %v1507_v33 = vsub.f32 %v2587_v1, %v1486_v54  ;;  %v1476_v55 = vmul.f32 0.6931472, %v2056_v18 }
 0x516   :  { %v2058_v56 = vpop.eup %2057  ;;  %v1464_v57 = vpop.xlane.xlu0 %1463 }
 0x517   :  { %1523 = vst [vmem:[#allocation2 + $0x50] sm:$0xff] %v1507_v33  ;;  %v1502_v0 = vsub.f32 %v2585_v20, %v1476_v55  ;;  %v1482_v19 = vmul.f32 0.6931472, %v2058_v56  ;;  %2069 = vlog2.f32 %v1464_v57 }
 0x518   :  { %v2060_v59 = vpop.eup %2059 }
 0x519   :  { %1518 = vst [vmem:[#allocation2 + $0x28] sm:$0xff] %v1502_v0  ;;  %v1505_v3 = vsub.f32 %v2593_v43, %v1482_v19  ;;  %v1488_v31 = vmul.f32 0.6931472, %v2060_v59 }
 0x51a   :  { %v2062_v37 = vpop.eup %2061 }
 0x51b   :  { %1521 = vst [vmem:[#allocation2 + $0x40] sm:$0xff] %v1505_v3  ;;  %v1508_v34 = vsub.f32 %v2591_v23, %v1488_v31  ;;  %v1490_v4 = vmul.f32 0.6931472, %v2062_v37 }
 0x51c   :  { %v2064_v21 = vpop.eup %2063 }
 0x51d   :  { %1524 = vst [vmem:[#allocation2 + $0x58] sm:$0xff] %v1508_v34  ;;  %v1509_v1 = vsub.f32 %v2599_v5, %v1490_v4  ;;  %v1484_v60 = vmul.f32 0.6931472, %v2064_v21 }
 0x51e   :  { %v2066_v28 = vpop.eup %2065 }
 0x51f   :  { %1525 = vst [vmem:[#allocation2 + $0x60] sm:$0xff] %v1509_v1  ;;  %v1506_v20 = vsub.f32 %v2597_v46, %v1484_v60  ;;  %v1494_v11 = vmul.f32 0.6931472, %v2066_v28 }
 0x520   :  { %v2068_v29 = vpop.eup %2067 }
 0x521   :  { %1522 = vst [vmem:[#allocation2 + $0x48] sm:$0xff] %v1506_v20  ;;  %v1492_v61 = vmul.f32 0.6931472, %v2068_v29  ;;  %v1511_v43 = vsub.f32 %v2607_v53, %v1494_v11 }
 0x523   :  { %v1510_v30 = vsub.f32 %v2604_v52, %v1492_v61  ;;  %1527 = vst [vmem:[#allocation2 + $0x70] sm:$0xff] %v1511_v43 }
 0x524   :  { %v2070_v22 = vpop.eup %2069 }
 0x525   :  { %1526 = vst [vmem:[#allocation2 + $0x68] sm:$0xff] %v1510_v30  ;;  %v1496_v23 = vmul.f32 0.6931472, %v2070_v22 }
 0x527   :  { %v1512_v5 = vsub.f32 %v2612_v58, %v1496_v23 }
 0x529   :  { %1528 = vst [vmem:[#allocation2 + $0x78] sm:$0xff] %v1512_v5 }
 0x52a   :  { %2082 = shalt.err (!%p2079_p4)
}
 0x52b   :  { %s2098_s19 = smov 128   ;;  %s2099_s1 = smov 8  }
 0x52c   :  { %1540 = dma.vmem_to_hbm [thread:$0]  %s1535_s18, 2048, %s2640_s6, [#allocation3], %s2098_s19, %s2098_s19, %s2099_s1  }
 0x52d   :  { %2091 = dma.done.wait [#allocation3], 2048  }
 0x52e   :  { %2092 = vsyncadd [#allocation3], 4294965248 }
 0x52f   :  { %1544 = vsyncpa [#allocation3], 1 }

</bundles_post_ra>
